<compile_context>
chip_gen: v7x
topology: tpu7x:2x2x1
jax: 0.10.0
libtpu: 0.0.40
codegen_flags: <defaults>
</compile_context>

<pallas_src>
import functools

import jax
import jax.numpy as jnp
from jax.experimental import pallas as pl
from jax.experimental.pallas import tpu as pltpu

DEFAULT_COEF = 0.97  # module's __init__ default


def _preemphasis_kernel(x_ref, o_ref, *, coef):
    # x_ref / o_ref: (TB, T) tiles resident in VMEM; time on the lane axis.
    x = x_ref[...].astype(jnp.float32)

    # prev[:, t] = x[:, t-1]  (wraps at t == 0; fixed by the column-0 store below)
    prev = pltpu.roll(x, shift=1, axis=1)

    # conv1d with flipped_filter [-coef, 1.0]:  y[t] = x[t] - coef * x[t-1]
    o_ref[...] = (x - coef * prev).astype(o_ref.dtype)

    # Reflect padding: the sample "before" t = 0 is x[:, 1].
    o_ref[:, 0:1] = (x[:, 0:1] - coef * x[:, 1:2]).astype(o_ref.dtype)


def _choose_batch_tile(B: int, T: int) -> int:
    # ~4 MiB of f32 per buffer: with double-buffered input + output (4 buffers)
    # that is <= ~16 MiB VMEM, safe even on v7x (64 MiB physical / 32 MiB scoped).
    budget_rows = max(1, (4 * 1024 * 1024) // (T * 4))
    if B <= budget_rows:
        return B  # single full-extent block: always layout-legal, no pipelining needed
    return max(8, (budget_rows // 8) * 8)  # multiple of 8 sublanes


def pre_emphasis(x: jax.Array, coef: float = DEFAULT_COEF, *, block_rows: int | None = None):
    assert x.ndim == 2, "The number of dimensions of input tensor must be 2!"
    B, T = x.shape
    assert T >= 2, "reflect padding requires T >= 2"

    tb = block_rows if block_rows is not None else _choose_batch_tile(B, T)
    tb = min(tb, B)
    grid = (pl.cdiv(B, tb),)

    kernel = functools.partial(_preemphasis_kernel, coef=coef)
    return pl.pallas_call(
        kernel,
        out_shape=jax.ShapeDtypeStruct((B, T), x.dtype),
        grid=grid,
        in_specs=[pl.BlockSpec((tb, T), lambda i: (i, 0))],
        out_specs=pl.BlockSpec((tb, T), lambda i: (i, 0)),
        compiler_params=pltpu.CompilerParams(
            dimension_semantics=("parallel",),   # shard batch tiles across TCs (v7x)
            vmem_limit_bytes=32 * 1024 * 1024,   # explicit headroom over buffer use
        ),
    )(x)


def _reference(x: jax.Array, coef: float = DEFAULT_COEF) -> jax.Array:
    # Pure-JAX reference mirroring F.pad(reflect, left=1) + conv1d([-coef, 1.0]).
    padded = jnp.concatenate([x[:, 1:2], x], axis=1)
    return -coef * padded[:, :-1] + 1.0 * padded[:, 1:]


if __name__ == "__main__":
    key = jax.random.PRNGKey(0)
    k1, k2 = jax.random.split(key)

    # Small shape consistent with the module's 2-D (batch, time) input.
    B, T = 2, 16
    x = jax.random.normal(k1, (B, T), dtype=jnp.float32)
    y = pre_emphasis(x)
    jax.block_until_ready(y)
    assert y.shape == (B, T) and y.dtype == x.dtype
    assert jnp.allclose(y, _reference(x), atol=1e-6, rtol=1e-6), "mismatch vs reference"

    # Also exercise the gridded (tiled-batch, ragged last block) path.
    B2, T2 = 20, 128
    x2 = jax.random.normal(k2, (B2, T2), dtype=jnp.float32)
    y2 = pre_emphasis(x2, block_rows=8)
    jax.block_until_ready(y2)
    assert jnp.allclose(y2, _reference(x2), atol=1e-6, rtol=1e-6), "mismatch vs reference (tiled)"

    print("KERNEL_OK")
</pallas_src>

<mosaic_0001>
module attributes {stable_mosaic.version = 11 : i64} {
  func.func @_preemphasis_kernel(%arg0: i32, %arg1: memref<2x16xf32, #tpu.memory_space<vmem>>, %arg2: memref<2x16xf32, #tpu.memory_space<vmem>>) attributes {dimension_semantics = [#tpu.dimension_semantics<parallel>], iteration_bounds = array<i64: 1>, scalar_prefetch = 0 : i64, scratch_operands = 0 : i64, tpu.core_type = #tpu.core_type<tc>, window_params = [{transform_indices = @transform_0, window_bounds = array<i64: 2, 16>}, {transform_indices = @transform_1, window_bounds = array<i64: 2, 16>}]} {
    %c0 = arith.constant 0 : index
    %c0_0 = arith.constant 0 : index
    %0 = vector.load %arg1[%c0, %c0_0] : memref<2x16xf32, #tpu.memory_space<vmem>>, vector<2x16xf32>
    %c1_i32 = arith.constant 1 : i32
    %1 = tpu.dynamic_rotate %0 by %c1_i32 dim 1 : vector<2x16xf32>, i32 -> vector<2x16xf32>
    %cst = arith.constant 9.700000e-01 : f32
    %2 = vector.broadcast %cst : f32 to vector<2x16xf32>
    %3 = arith.mulf %2, %1 : vector<2x16xf32>
    %4 = arith.subf %0, %3 : vector<2x16xf32>
    %c0_1 = arith.constant 0 : index
    %c0_2 = arith.constant 0 : index
    %5 = vector.load %arg2[%c0_1, %c0_2] : memref<2x16xf32, #tpu.memory_space<vmem>>, vector<2x16xf32>
    tpu.vector_store %arg2[%c0_1, %c0_2], %4 {strides = array<i32>} : memref<2x16xf32, #tpu.memory_space<vmem>>, vector<2x16xf32>,
    %6 = vector.extract_strided_slice %0 {offsets = [0, 0], sizes = [2, 1], strides = [1, 1]} : vector<2x16xf32> to vector<2x1xf32>
    %7 = vector.extract_strided_slice %0 {offsets = [0, 1], sizes = [2, 1], strides = [1, 1]} : vector<2x16xf32> to vector<2x1xf32>
    %cst_3 = arith.constant 9.700000e-01 : f32
    %8 = vector.broadcast %cst_3 : f32 to vector<2x1xf32>
    %9 = arith.mulf %8, %7 : vector<2x1xf32>
    %10 = arith.subf %6, %9 : vector<2x1xf32>
    %c0_4 = arith.constant 0 : index
    %c0_5 = arith.constant 0 : index
    %11 = vector.load %arg2[%c0_4, %c0_5] : memref<2x16xf32, #tpu.memory_space<vmem>>, vector<2x1xf32>
    tpu.vector_store %arg2[%c0_4, %c0_5], %10 {strides = array<i32>} : memref<2x16xf32, #tpu.memory_space<vmem>>, vector<2x1xf32>,
    return
  }
  func.func @transform_0(%arg0: i32) -> (i32, i32) {
    %c0_i32 = arith.constant 0 : i32
    %c0_i32_0 = arith.constant 0 : i32
    return %arg0, %c0_i32 : i32, i32
  }
  func.func @transform_1(%arg0: i32) -> (i32, i32) {
    %c0_i32 = arith.constant 0 : i32
    %c0_i32_0 = arith.constant 0 : i32
    return %arg0, %c0_i32 : i32, i32
  }
}

</mosaic_0001>

<bundles_post_ra>
// kernel: tpu_custom_call.1
= control target key start
LH: loop header
LB: loop body
LE: loop exit
PB: predicated region body
PF: predicated region fallthrough
CT: control target
= control target key end

     0   :  { %6 = vsyncpa [#allocation3], 0  ;;  %s152_s0 = inlined_call_operand.hbm [shape: f32[2,16], index: 0, kind: input, shape index: {}]   ;;  %s153_s1 = inlined_call_operand.hbm [shape: f32[2,16], index: 1, kind: output, shape index: {}]  }
   0x1   :  { %7 = vsyncpa [#allocation4], 0  ;;  %s113_s6 = smov [#allocation2]   ;;  %s65_s10 = scalar_lea.hbm %s152_s0, 32 }
   0x2   :  { %s14_s7 = sshll.u32 %s113_s6, 4  ;;  %p66_p0 = scmp.ne.s32.totalorder %s152_s0, %s65_s10  ;;  %s15_s7 = int_to_ptr.vmem [resolvable:$true] %s14_s7 }
   0x3   :  { %p69_p1 = scmp.lt.u32.totalorder %s65_s10, %s152_s0 }
   0x5   :  { %p71_p2 = pnand %p69_p1, %p66_p0 }
   0x7   :  { %74 = shalt.err (!%p71_p2)
}
   0x8   :  { %s75_s15 = scalar_lea.vmem %s15_s7, 32  ;;  %p80_p4 = scmp.lt.s32.totalorder %s15_s7, %s15_s7 }
   0x9   :  { %p76_p3 = scmp.ne.s32.totalorder %s15_s7, %s75_s15  ;;  %p81_p5 = scmp.lt.s32.totalorder %s75_s15, %s75_s15 }
   0xb   :  { %p82_p6 = por %p81_p5, %p80_p4 }
   0xd   :  { %p83_p7 = pnand %p82_p6, %p76_p3 }
   0xf   :  { %86 = shalt.err (!%p83_p7)
}
  0x10   :  { %17 = dma.hbm_to_vmem [thread:$0]  %s152_s0, 32, %s15_s7, [#allocation3]  }
  0x11   :  { %109 = dma.done.wait [#allocation3], 32  }
  0x12   :  { %110 = vsyncadd [#allocation3], 4294967264  ;;  %v21_v0 = vld [vmem:[#allocation2] sm:$0x3]  ;;  %s114_s18 = smov 16   ;;  %vm22_vm0 = vcmask 1047680  }
  0x13   :  { %23 = vrot.lane.b32.xlu0 %v21_v0, %s114_s18  ;;  %s115_s19 = smov 113   ;;  %v37_v6 = vmul.f32 0.97, %v21_v0  ;;  %s116_s20 = smov 127   ;;  %vm35_vm1 = vcmask 123904   ;;  %vm43_vm2 = vcmask 1024  }
  0x14   :  { %s117_s0 = smov [#allocation5]  }
  0x15   :  { %s51_s21 = sshll.u32 %s117_s0, 4  ;;  %s52_s21 = int_to_ptr.vmem [resolvable:$true] %s51_s21 }
  0x16   :  { %s87_s22 = scalar_lea.vmem %s52_s21, 32  ;;  %p92_p9 = scmp.lt.s32.totalorder %s52_s21, %s52_s21 }
  0x17   :  { %p88_p8 = scmp.ne.s32.totalorder %s52_s21, %s87_s22  ;;  %p93_p10 = scmp.lt.s32.totalorder %s87_s22, %s87_s22 }
  0x19   :  { %p94_p11 = por %p93_p10, %p92_p9 }
  0x1b   :  { %p95_p12 = pnand %p94_p11, %p88_p8 }
  0x85   :  { %v24_v1 = vpop.permute.xlu0 %23 }
  0x86   :  { %v25_v2 = vsel %vm22_vm0, %v24_v1, %v21_v0 }
  0x87   :  { %26 = vrot.lane.b32.xlu0 %v25_v2, %s114_s18 }
  0xf9   :  { %v27_v3 = vpop.permute.xlu0 %26 }
  0xfa   :  { %v28_v4 = vsel %vm22_vm0, %v27_v3, %v21_v0 }
  0xfb   :  { %v29_v5 = vmul.f32 0.97, %v28_v4 }
  0xfd   :  { %31 = vrot.lane.b32.xlu1 %v29_v5, %s115_s19 }
 0x101   :  { %39 = vrot.lane.b32.xlu1 %v37_v6, %s116_s20 }
 0x16f   :  { %v32_v7 = vpop.permute.xlu1 %31 }
 0x170   :  { %v34_v8 = vsub.f32 %v21_v0, %v32_v7 }
 0x172   :  { %36 = vst.msk [vmem:[#allocation5] sm:$0x3] %vm35_vm1, %v34_v8 }
 0x173   :  { %v40_v9 = vpop.permute.xlu1 %39 }
 0x174   :  { %v42_v10 = vsub.f32 %v21_v0, %v40_v9 }
 0x176   :  { %44 = vst.msk [vmem:[#allocation5] sm:$0x3] %vm43_vm2, %v42_v10 }
 0x177   :  { %98 = shalt.err (!%p95_p12)
}
 0x178   :  { %s99_s25 = scalar_lea.hbm %s153_s1, 32 }
 0x179   :  { %p100_p13 = scmp.ne.s32.totalorder %s153_s1, %s99_s25  ;;  %p103_p0 = scmp.lt.u32.totalorder %s99_s25, %s153_s1 }
 0x17b   :  { %p105_p1 = pnand %p103_p0, %p100_p13 }
 0x17d   :  { %108 = shalt.err (!%p105_p1)
}
 0x17e   :  { %54 = dma.vmem_to_hbm [thread:$0]  %s52_s21, 32, %s153_s1, [#allocation4]  }
 0x17f   :  { %111 = dma.done.wait [#allocation4], 32  }
 0x180   :  { %112 = vsyncadd [#allocation4], 4294967264 }
 0x181   :  { %58 = vsyncpa [#allocation3], 1 }
 0x182   :  { %59 = vsyncpa [#allocation4], 1 }

</bundles_post_ra>
